<compile_context>
chip_gen: v6e
topology: v6e:2x2x1
jax: 0.10.0
libtpu: 0.0.40
codegen_flags: <defaults>
</compile_context>

<pallas_src>
import jax
import jax.numpy as jnp
from jax.experimental import pallas as pl
from jax.experimental.pallas import tpu as pltpu


def _linear_tanh_kernel(x_ref, w_ref, b_ref, o_ref):
    # One MXU matmul (f32 accumulation) + bias-add (VPU) + tanh (EUP).
    y = jnp.dot(x_ref[...], w_ref[...], preferred_element_type=jnp.float32)
    o_ref[...] = jnp.tanh(y + b_ref[...]).astype(o_ref.dtype)


def _linear_tanh_small(x, w, b):
    """Single-shot path: no grid, no pipelining, whole arrays resident in VMEM."""
    B = x.shape[0]
    N = w.shape[1]
    vmem = pl.BlockSpec(memory_space=pltpu.MemorySpace.VMEM)
    return pl.pallas_call(
        _linear_tanh_kernel,
        out_shape=jax.ShapeDtypeStruct((B, N), x.dtype),
        in_specs=[vmem, vmem, vmem],
        out_specs=vmem,
    )(x, w, b)


def _linear_tanh_tiled(x, w, b, *, tb=4096):
    """Batch-tiled path for large B.

    - Unpadded (B, 11) output (block last dim == full dim -> legal BlockSpec).
    - No input padding: cdiv grid; Pallas masks the ragged final block.
    - W/b resident across the grid via constant index_map.
    - Batch axis "parallel" (v7x: both TensorCores take grid steps).
    """
    B, K = x.shape
    N = w.shape[1]
    grid = (pl.cdiv(B, tb),)
    # Double-buffered, lane-padded (128-lane) x and out tiles + resident W/b + slack.
    vmem_bytes = min(28 << 20, 4 * tb * 128 * 4 + (2 << 20))
    return pl.pallas_call(
        _linear_tanh_kernel,
        out_shape=jax.ShapeDtypeStruct((B, N), x.dtype),
        grid=grid,
        in_specs=[
            pl.BlockSpec((tb, K), lambda i: (i, 0)),
            pl.BlockSpec((K, N), lambda i: (0, 0)),
            pl.BlockSpec((1, N), lambda i: (0, 0)),
        ],
        out_specs=pl.BlockSpec((tb, N), lambda i: (i, 0)),
        compiler_params=pltpu.CompilerParams(
            dimension_semantics=("parallel",),
            vmem_limit_bytes=vmem_bytes,
        ),
    )(x, w, b)


def linear_tanh(x, w, b):
    """y = tanh(x @ w + b).  x: (B, 7), w: (7, 11), b: (11,) or (1, 11)."""
    b = jnp.reshape(b, (1, w.shape[1]))  # normalize PyTorch-style 1-D bias
    B = x.shape[0]
    if B <= 4096:
        return _linear_tanh_small(x, w, b)
    return _linear_tanh_tiled(x, w, b)


if __name__ == "__main__":
    key = jax.random.PRNGKey(0)
    kx, kw, kb, kx2 = jax.random.split(key, 4)

    B, IN, OUT = 8, 7, 11
    x = jax.random.normal(kx, (B, IN), dtype=jnp.float32)

    # Deterministic init mimicking nn.Linear default: U(-1/sqrt(in), 1/sqrt(in))
    bound = 1.0 / jnp.sqrt(jnp.float32(IN))
    w = jax.random.uniform(kw, (IN, OUT), minval=-bound, maxval=bound,
                           dtype=jnp.float32)
    b = jax.random.uniform(kb, (OUT,), minval=-bound, maxval=bound,
                           dtype=jnp.float32)

    # Small-batch single-shot path (matches the spec's shape regime).
    out = linear_tanh(x, w, b)
    jax.block_until_ready(out)
    ref = jnp.tanh(x @ w + b[None, :])
    assert out.shape == (B, OUT)
    assert jnp.allclose(out, ref, atol=1e-5, rtol=1e-5)

    # Exercise the batch-tiled path directly with a small tile so we hit the
    # cdiv grid + ragged final block (520 = 2*256 + 8) without padding.
    B2 = 520
    x2 = jax.random.normal(kx2, (B2, IN), dtype=jnp.float32)
    out2 = _linear_tanh_tiled(x2, w, jnp.reshape(b, (1, OUT)), tb=256)
    jax.block_until_ready(out2)
    ref2 = jnp.tanh(x2 @ w + b[None, :])
    assert out2.shape == (B2, OUT)
    assert jnp.allclose(out2, ref2, atol=1e-5, rtol=1e-5)

    print("KERNEL_OK")
</pallas_src>

<mosaic_0001>
module attributes {stable_mosaic.version = 11 : i64} {
  func.func @_linear_tanh_kernel(%arg0: memref<8x7xf32, #tpu.memory_space<vmem>>, %arg1: memref<7x11xf32, #tpu.memory_space<vmem>>, %arg2: memref<1x11xf32, #tpu.memory_space<vmem>>, %arg3: memref<8x11xf32, #tpu.memory_space<vmem>>) attributes {dimension_semantics = [], scalar_prefetch = 0 : i64, scratch_operands = 0 : i64, tpu.core_type = #tpu.core_type<tc>} {
    %c0 = arith.constant 0 : index
    %c0_0 = arith.constant 0 : index
    %0 = vector.load %arg0[%c0, %c0_0] : memref<8x7xf32, #tpu.memory_space<vmem>>, vector<8x7xf32>
    %c0_1 = arith.constant 0 : index
    %c0_2 = arith.constant 0 : index
    %1 = vector.load %arg1[%c0_1, %c0_2] : memref<7x11xf32, #tpu.memory_space<vmem>>, vector<7x11xf32>
    %cst = arith.constant dense<0.000000e+00> : vector<8x11xf32>
    %2 = tpu.matmul %0, %1, %cst {dimension_numbers = #tpu.dot_dimension_numbers<[1], [0], [0], [1], [0, 0, 1, 1], [], []>} : vector<8x7xf32>, vector<7x11xf32>, vector<8x11xf32> -> vector<8x11xf32>
    %c0_3 = arith.constant 0 : index
    %c0_4 = arith.constant 0 : index
    %3 = vector.load %arg2[%c0_3, %c0_4] : memref<1x11xf32, #tpu.memory_space<vmem>>, vector<1x11xf32>
    %4 = vector.broadcast %3 : vector<1x11xf32> to vector<8x11xf32>
    %5 = arith.addf %2, %4 : vector<8x11xf32>
    %6 = math.tanh %5 : vector<8x11xf32>
    %c0_5 = arith.constant 0 : index
    %c0_6 = arith.constant 0 : index
    %7 = vector.load %arg3[%c0_5, %c0_6] : memref<8x11xf32, #tpu.memory_space<vmem>>, vector<8x11xf32>
    tpu.vector_store %arg3[%c0_5, %c0_6], %6 {strides = array<i32>} : memref<8x11xf32, #tpu.memory_space<vmem>>, vector<8x11xf32>,
    return
  }
}

</mosaic_0001>

<bundles_post_ra>
// kernel: tpu_custom_call.1
= control target key start
LH: loop header
LB: loop body
LE: loop exit
PB: predicated region body
PF: predicated region fallthrough
CT: control target
= control target key end

     0   :  { %8 = vsyncpa [#allocation3], 0  ;;  %s265_s0 = inlined_call_operand.hbm [shape: f32[8,7], index: 0, kind: input, shape index: {}]   ;;  %s266_s1 = inlined_call_operand.hbm [shape: f32[7,11], index: 1, kind: input, shape index: {}]   ;;  %s267_s2 = inlined_call_operand.vmem [shape: f32[1,11], index: 2, kind: input, shape index: {}]   ;;  %s268_s3 = inlined_call_operand.hbm [shape: f32[8,11], index: 3, kind: output, shape index: {}]  }
   0x1   :  { %9 = vsyncpa [#allocation6], 0 }
   0x2   :  { %10 = vsyncpa [#allocation4], 0  ;;  %s228_s12 = smov [#allocation2]   ;;  %s229_s14 = smov [#allocation5]  }
   0x3   :  { %s17_s13 = sshll.u32 %s228_s12, 4  ;;  %s27_s15 = sshll.u32 %s229_s14, 4  ;;  %s18_s13 = int_to_ptr.vmem [resolvable:$true] %s17_s13  ;;  %s28_s15 = int_to_ptr.vmem [resolvable:$true] %s27_s15 }
   0x4   :  { %s170_s16 = scalar_lea.vmem %s18_s13, 128  ;;  %p175_p1 = scmp.lt.s32.totalorder %s18_s13, %s18_s13 }
   0x5   :  { %p171_p0 = scmp.ne.s32.totalorder %s18_s13, %s170_s16  ;;  %p176_p2 = scmp.lt.s32.totalorder %s170_s16, %s170_s16 }
   0x7   :  { %p177_p3 = por %p176_p2, %p175_p1 }
   0x9   :  { %p178_p4 = pnand %p177_p3, %p171_p0 }
   0xb   :  { %181 = shalt.err (!%p178_p4)
}
   0xc   :  { %20 = dma.hbm_to_vmem [thread:$0]  %s265_s0, 128, %s18_s13, [#allocation3]  }
   0xd   :  { %s190_s19 = scalar_lea.vmem %s28_s15, 128  ;;  %p195_p6 = scmp.lt.s32.totalorder %s28_s15, %s28_s15 }
   0xe   :  { %p191_p5 = scmp.ne.s32.totalorder %s28_s15, %s190_s19  ;;  %p196_p7 = scmp.lt.s32.totalorder %s190_s19, %s190_s19 }
  0x10   :  { %p197_p8 = por %p196_p7, %p195_p6 }
  0x12   :  { %p198_p9 = pnand %p197_p8, %p191_p5 }
  0x14   :  { %201 = shalt.err (!%p198_p9)
}
  0x15   :  { %30 = dma.hbm_to_vmem [thread:$0]  %s266_s1, 128, %s28_s15, [#allocation6]  }
  0x16   :  { %222 = dma.done.wait [#allocation3], 128  }
  0x17   :  { %223 = vsyncadd [#allocation3], 4294967168 }
  0x18   :  { %224 = dma.done.wait [#allocation6], 128  }
  0x19   :  { %225 = vsyncadd [#allocation6], 4294967168  ;;  %v230_v0 = vmov 0.0   ;;  %vm231_vm0 = vmmov 0   ;;  %vm52_vm1 = vcmask 1046528   ;;  %vm48_vm2 = vcmask 56320  }
  0x1a   :  { %150 = vmatprep.subr.mxu0 %v230_v0  ;;  %152 = vmatprep.mubr.msk.f32.mxu0 %vm231_vm0, %v230_v0  ;;  %v40_v1 = vld [vmem:[#allocation5] sm:$0x7f]  ;;  %v39_v2 = vld [vmem:[#allocation2] sm:$0xff]  ;;  %s232_s1 = smov [#allocation7]   ;;  %vm127_vm3 = vcmask 89088  }
  0x1b   :  { %151 = vmatpush3.msk.msra.mxu0 %vm52_vm1, %v40_v1  ;;  %v145_v3 = vld [vmem:[%s267_s2] ss:$0 sm:$0xff]  ;;  %s135_s23 = sshll.u32 %s232_s1, 4  ;;  %s136_s23 = int_to_ptr.vmem [resolvable:$true] %s135_s23 }
  0x1c   :  { %153 = vmatmul.mubr.msk.f32.vlgmr.msra.gmra.mxu0 %vm48_vm2, %v39_v2  ;;  %s202_s24 = scalar_lea.vmem %s136_s23, 128  ;;  %p207_p11 = scmp.lt.s32.totalorder %s136_s23, %s136_s23 }
  0x1d   :  { %p203_p10 = scmp.ne.s32.totalorder %s136_s23, %s202_s24  ;;  %p208_p12 = scmp.lt.s32.totalorder %s202_s24, %s202_s24 }
  0x1f   :  { %p209_p13 = por %p208_p12, %p207_p11 }
  0x21   :  { %p210_p0 = pnand %p209_p13, %p203_p10 }
  0xdc   :  { %v122_v4 = vpop.f32.mrf.mxu0 }
  0xdd   :  { %v123_v5 = vadd.f32 %v145_v3, %v122_v4 }
  0xde   :  { %v154_v6 = vpop.f32.mrf.mxu0 }
  0xdf   :  { %160 = vtanh.f32 %v123_v5 }
  0xec   :  { %v161_v7 = vpop.eup %160 }
  0xed   :  { %128 = vst.msk [vmem:[#allocation7] sm:$0xff] %vm127_vm3, %v161_v7 }
  0xee   :  { %213 = shalt.err (!%p210_p0)
}
  0xef   :  { %138 = dma.vmem_to_hbm [thread:$0]  %s136_s23, 128, %s268_s3, [#allocation4]  }
  0xf0   :  { %226 = dma.done.wait [#allocation4], 128  }
  0xf1   :  { %227 = vsyncadd [#allocation4], 4294967168 }
  0xf2   :  { %142 = vsyncpa [#allocation3], 1 }
  0xf3   :  { %143 = vsyncpa [#allocation6], 1 }
  0xf4   :  { %144 = vsyncpa [#allocation4], 1 }

</bundles_post_ra>
